<compile_context>
chip_gen: v6e
topology: v6e:2x2x1
jax: 0.10.0
libtpu: 0.0.40
codegen_flags: <defaults>
</compile_context>

<pallas_src>
import jax
import jax.numpy as jnp
from jax.experimental import pallas as pl
from jax.experimental.pallas import tpu as pltpu


# --------------------------- kernel bodies ---------------------------------

def _hsigmoid_kernel(x_ref, o_ref):
    x = x_ref[...].astype(jnp.float32)
    y = jnp.clip(x + 3.0, 0.0, 6.0) * (1.0 / 6.0)
    o_ref[...] = y.astype(o_ref.dtype)


def _hswish_kernel(x_ref, o_ref):
    x = x_ref[...].astype(jnp.float32)
    y = x * (jnp.clip(x + 3.0, 0.0, 6.0) * (1.0 / 6.0))
    o_ref[...] = y.astype(o_ref.dtype)


# --------------------------- jnp fallbacks / references ---------------------

def _hsigmoid_jnp(x):
    xf = x.astype(jnp.float32)
    return (jnp.clip(xf + 3.0, 0.0, 6.0) * (1.0 / 6.0)).astype(x.dtype)


def _hswish_jnp(x):
    xf = x.astype(jnp.float32)
    return (xf * (jnp.clip(xf + 3.0, 0.0, 6.0) * (1.0 / 6.0))).astype(x.dtype)


# --------------------------- launch plumbing --------------------------------

_LANE_CANDIDATES = (1024, 512, 256, 128)
_MIN_GRID_STEPS = 4            # >= 2 steps per TensorCore on v7x
_SMALL_FALLBACK_BYTES = 1 << 20  # below this, launch overhead dominates


def _default_target_block_bytes():
    """Per-generation block-size target, conservative on older chips."""
    try:
        kind = jax.devices()[0].device_kind.lower()
    except Exception:
        return 2 * 1024 * 1024
    if any(tag in kind for tag in ("v2", "v3", "v4", "v5")):
        # v5e scoped-VMEM default is 16 MiB: 4 buffers x 2 MiB = 8 MiB.
        return 2 * 1024 * 1024
    # v6e / v7x scoped-VMEM default is 32 MiB: 4 buffers x 4 MiB = 16 MiB.
    return 4 * 1024 * 1024


def _launch_elementwise(kernel_body, jnp_fallback, flops_per_elem, x, *,
                        target_block_bytes=None, in_place=False,
                        force_pallas=False):
    orig_shape, orig_dtype = x.shape, x.dtype
    n = x.size
    itemsize = jnp.dtype(orig_dtype).itemsize

    if n == 0:
        return x

    # Small tensors and ragged total sizes: the fused jnp expression is already
    # one HBM read + one write (and XLA can fuse it into neighbours); a Pallas
    # launch would only add fixed overhead (or pad/slice copies for ragged n).
    ragged = (n % 128) != 0
    if ragged or (not force_pallas and n * itemsize < _SMALL_FALLBACK_BYTES):
        return jnp_fallback(x)

    if target_block_bytes is None:
        target_block_bytes = _default_target_block_bytes()

    # Free row-major reshape into a lane-dense (rows, lane) slab.
    lane = next(l for l in _LANE_CANDIDATES if n % l == 0)
    rows = n // lane
    x2d = x.reshape(rows, lane)

    # Sublane alignment for the second-to-last block dim (packed dtypes need
    # taller native tiles: f32 -> 8, bf16 -> 16, int8/fp8 -> 32).
    row_align = 8 * max(1, 4 // itemsize)

    max_block_rows = max(row_align,
                         (target_block_bytes // (lane * itemsize))
                         // row_align * row_align)

    # Aim for at least _MIN_GRID_STEPS grid steps so (a) the pipeline stays
    # double-buffered and (b) the parallel grid axis can be split across both
    # TensorCores on v7x.  Ragged final blocks are masked by Pallas.
    desired_steps = max(_MIN_GRID_STEPS, pl.cdiv(rows, max_block_rows))
    block_rows = pl.cdiv(rows, desired_steps)
    block_rows = pl.cdiv(block_rows, row_align) * row_align
    block_rows = min(block_rows, max_block_rows)
    if block_rows >= rows:
        # Single full-extent block (exempt from the (8,128) rule).
        block_rows = rows

    grid = (pl.cdiv(rows, block_rows),)

    cost = pl.CostEstimate(
        flops=int(flops_per_elem * rows * lane),
        transcendentals=0,
        bytes_accessed=int(2 * rows * lane * itemsize),
    )

    out2d = pl.pallas_call(
        kernel_body,
        out_shape=jax.ShapeDtypeStruct((rows, lane), orig_dtype),
        grid_spec=pltpu.PrefetchScalarGridSpec(
            num_scalar_prefetch=0,
            grid=grid,
            in_specs=[pl.BlockSpec((block_rows, lane), lambda i: (i, 0))],
            out_specs=pl.BlockSpec((block_rows, lane), lambda i: (i, 0)),
        ),
        compiler_params=pltpu.CompilerParams(
            # Independent blocks -> shard grid steps across TensorCores.
            dimension_semantics=(pltpu.PARALLEL,),
        ),
        cost_estimate=cost,
        input_output_aliases=({0: 0} if in_place else {}),
    )(x2d)

    return out2d.reshape(orig_shape)


# --------------------------- public ops -------------------------------------

def hsigmoid(x, **kw):
    """relu6(x + 3) / 6, elementwise, any shape/dtype."""
    return _launch_elementwise(_hsigmoid_kernel, _hsigmoid_jnp, 4, x, **kw)


def hswish(x, **kw):
    """x * relu6(x + 3) / 6, elementwise (hsigmoid fused into the multiply)."""
    return _launch_elementwise(_hswish_kernel, _hswish_jnp, 5, x, **kw)


# --------------------------- test --------------------------------------------

if __name__ == "__main__":
    key = jax.random.PRNGKey(0)
    k0, k1, k2, k3 = jax.random.split(key, 4)

    # Primary check: small NCHW shape consistent with MobileNet usage, f32.
    # force_pallas=True so the tiny tensor exercises the kernel path too.
    x = jax.random.normal(k0, (2, 4, 16, 16), dtype=jnp.float32) * 4.0
    out_sig = jax.block_until_ready(hsigmoid(x, force_pallas=True))
    out_swi = jax.block_until_ready(hswish(x, force_pallas=True))
    assert out_sig.shape == x.shape and out_sig.dtype == x.dtype
    assert out_swi.shape == x.shape and out_swi.dtype == x.dtype
    assert jnp.allclose(out_sig, _hsigmoid_jnp(x), atol=1e-6, rtol=1e-6)
    assert jnp.allclose(out_swi, _hswish_jnp(x), atol=1e-6, rtol=1e-6)

    # Mid-size MobileNet-like activation: exercises the multi-step grid
    # (several lane-dense blocks, ragged final block masked by Pallas).
    xm = jax.random.normal(k1, (4, 576, 14, 14), dtype=jnp.float32) * 4.0
    om = jax.block_until_ready(hswish(xm))
    assert om.shape == xm.shape and om.dtype == xm.dtype
    assert jnp.allclose(om, _hswish_jnp(xm), atol=1e-6, rtol=1e-6)

    # bf16 path (halved HBM traffic), forced through the kernel.
    xb = (jax.random.normal(k2, (2, 96, 16, 16), dtype=jnp.float32) * 4.0
          ).astype(jnp.bfloat16)
    ob = jax.block_until_ready(hswish(xb, force_pallas=True))
    assert ob.shape == xb.shape and ob.dtype == xb.dtype
    assert jnp.allclose(ob.astype(jnp.float32),
                        _hswish_jnp(xb).astype(jnp.float32),
                        atol=2e-2, rtol=2e-2)

    # Ragged total size (n % 128 != 0) and tiny tensors: jnp fallback path.
    xr = jax.random.normal(k3, (2, 5, 7, 7), dtype=jnp.float32) * 4.0
    orr = jax.block_until_ready(hsigmoid(xr))
    assert orr.shape == xr.shape and orr.dtype == xr.dtype
    assert jnp.allclose(orr, _hsigmoid_jnp(xr), atol=1e-6, rtol=1e-6)

    print("KERNEL_OK")
</pallas_src>

<mosaic_0001>
module attributes {stable_mosaic.version = 11 : i64} {
  func.func @_hsigmoid_kernel(%arg0: i32, %arg1: memref<2x1024xf32, #tpu.memory_space<vmem>>, %arg2: memref<2x1024xf32, #tpu.memory_space<vmem>>) attributes {dimension_semantics = [#tpu.dimension_semantics<parallel>], iteration_bounds = array<i64: 1>, scalar_prefetch = 0 : i64, scratch_operands = 0 : i64, tpu.core_type = #tpu.core_type<tc>, window_params = [{transform_indices = @transform_0, window_bounds = array<i64: 2, 1024>}, {transform_indices = @transform_1, window_bounds = array<i64: 2, 1024>}]} {
    %c0 = arith.constant 0 : index
    %c0_0 = arith.constant 0 : index
    %0 = vector.load %arg1[%c0, %c0_0] : memref<2x1024xf32, #tpu.memory_space<vmem>>, vector<2x1024xf32>
    %cst = arith.constant 3.000000e+00 : f32
    %1 = vector.broadcast %cst : f32 to vector<2x1024xf32>
    %2 = arith.addf %0, %1 : vector<2x1024xf32>
    %cst_1 = arith.constant 0.000000e+00 : f32
    %cst_2 = arith.constant 6.000000e+00 : f32
    %3 = vector.broadcast %cst_1 : f32 to vector<2x1024xf32>
    %4 = arith.maximumf %3, %2 : vector<2x1024xf32>
    %5 = vector.broadcast %cst_2 : f32 to vector<2x1024xf32>
    %6 = arith.minimumf %5, %4 : vector<2x1024xf32>
    %cst_3 = arith.constant 0.166666672 : f32
    %7 = vector.broadcast %cst_3 : f32 to vector<2x1024xf32>
    %8 = arith.mulf %6, %7 : vector<2x1024xf32>
    %c0_4 = arith.constant 0 : index
    %c0_5 = arith.constant 0 : index
    %9 = vector.load %arg2[%c0_4, %c0_5] : memref<2x1024xf32, #tpu.memory_space<vmem>>, vector<2x1024xf32>
    tpu.vector_store %arg2[%c0_4, %c0_5], %8 {strides = array<i32>} : memref<2x1024xf32, #tpu.memory_space<vmem>>, vector<2x1024xf32>,
    return
  }
  func.func @transform_0(%arg0: i32) -> (i32, i32) {
    %c0_i32 = arith.constant 0 : i32
    %c0_i32_0 = arith.constant 0 : i32
    return %arg0, %c0_i32 : i32, i32
  }
  func.func @transform_1(%arg0: i32) -> (i32, i32) {
    %c0_i32 = arith.constant 0 : i32
    %c0_i32_0 = arith.constant 0 : i32
    return %arg0, %c0_i32 : i32, i32
  }
}

</mosaic_0001>

<bundles_post_ra>
// kernel: tpu_custom_call.1
= control target key start
LH: loop header
LB: loop body
LE: loop exit
PB: predicated region body
PF: predicated region fallthrough
CT: control target
= control target key end

     0   :  { %6 = vsyncpa [#allocation3], 0  ;;  %s112_s0 = inlined_call_operand.hbm [shape: f32[2,1024], index: 0, kind: input, shape index: {}]   ;;  %s113_s1 = inlined_call_operand.hbm [shape: f32[2,1024], index: 1, kind: output, shape index: {}]  }
   0x1   :  { %7 = vsyncpa [#allocation4], 0  ;;  %s94_s6 = smov [#allocation2]  }
   0x2   :  { %s14_s7 = sshll.u32 %s94_s6, 4  ;;  %s15_s7 = int_to_ptr.vmem [resolvable:$true] %s14_s7 }
   0x3   :  { %s58_s8 = scalar_lea.vmem %s15_s7, 256  ;;  %p63_p1 = scmp.lt.s32.totalorder %s15_s7, %s15_s7 }
   0x4   :  { %p59_p0 = scmp.ne.s32.totalorder %s15_s7, %s58_s8  ;;  %p64_p2 = scmp.lt.s32.totalorder %s58_s8, %s58_s8 }
   0x6   :  { %p65_p3 = por %p64_p2, %p63_p1 }
   0x8   :  { %p66_p4 = pnand %p65_p3, %p59_p0 }
   0xa   :  { %69 = shalt.err (!%p66_p4)
}
   0xb   :  { %17 = dma.hbm_to_vmem [thread:$0]  %s112_s0, 256, %s15_s7, [#allocation3]  }
   0xc   :  { %90 = dma.done.wait [#allocation3], 256  }
   0xd   :  { %91 = vsyncadd [#allocation3], 4294967040  ;;  %v21_v0 = vld [vmem:[#allocation2] sm:$0xff]  ;;  %v22_v1 = vld [vmem:[#allocation2 + $0x8] sm:$0xff]  ;;  %s95_s11 = smov [#allocation5]  }
   0xe   :  { %v23_v2 = vadd.f32 3.0, %v21_v0  ;;  %v24_v3 = vadd.f32 3.0, %v22_v1  ;;  %s39_s12 = sshll.u32 %s95_s11, 4  ;;  %s40_s12 = int_to_ptr.vmem [resolvable:$true] %s39_s12 }
   0xf   :  { %s70_s13 = scalar_lea.vmem %s40_s12, 256  ;;  %p75_p6 = scmp.lt.s32.totalorder %s40_s12, %s40_s12 }
  0x10   :  { %v25_v4 = vmax.f32 %v23_v2, 0.0  ;;  %v26_v5 = vmax.f32 %v24_v3, 0.0  ;;  %p71_p5 = scmp.ne.s32.totalorder %s40_s12, %s70_s13  ;;  %p76_p7 = scmp.lt.s32.totalorder %s70_s13, %s70_s13 }
  0x12   :  { %v27_v6 = vmin.f32 %v25_v4, 6.0  ;;  %v28_v7 = vmin.f32 %v26_v5, 6.0  ;;  %p77_p8 = por %p76_p7, %p75_p6 }
  0x14   :  { %v29_v8 = vmul.f32 0.16666667, %v27_v6  ;;  %v30_v9 = vmul.f32 0.16666667, %v28_v7  ;;  %p78_p9 = pnand %p77_p8, %p71_p5 }
  0x16   :  { %31 = vst [vmem:[#allocation5] sm:$0xff] %v29_v8  ;;  %32 = vst [vmem:[#allocation5 + $0x8] sm:$0xff] %v30_v9 }
  0x17   :  { %81 = shalt.err (!%p78_p9)
}
  0x18   :  { %42 = dma.vmem_to_hbm [thread:$0]  %s40_s12, 256, %s113_s1, [#allocation4]  }
  0x19   :  { %92 = dma.done.wait [#allocation4], 256  }
  0x1a   :  { %93 = vsyncadd [#allocation4], 4294967040 }
  0x1b   :  { %46 = vsyncpa [#allocation3], 1 }
  0x1c   :  { %47 = vsyncpa [#allocation4], 1 }

</bundles_post_ra>
